<compile_context>
chip_gen: v7x
topology: tpu7x:2x2x1
jax: 0.10.0
libtpu: 0.0.40
codegen_flags: <defaults>
</compile_context>

<pallas_src>
import functools
import math

import jax
import jax.numpy as jnp
import numpy as np
from jax import lax
from jax.experimental import pallas as pl
from jax.experimental.pallas import tpu as pltpu

_MIB = 1024 * 1024


# --------------------------------------------------------------------------
# Helpers
# --------------------------------------------------------------------------
def _pick_tile(dim, target, multiple):
    """Largest tile <= target that divides `dim` and is a multiple of
    `multiple`; falls back to the full dimension (always a legal block)."""
    if dim <= target:
        return dim
    t = (target // multiple) * multiple
    while t >= multiple:
        if dim % t == 0:
            return t
        t -= multiple
    return dim


def _nbytes(shape, dtype):
    return int(np.prod(shape)) * jnp.dtype(dtype).itemsize


def _compiler_params(dim_sem, est_bytes):
    """Scoped-VMEM budget sized from the kernel's actual footprint (defaults
    are only 16/32 MiB), with headroom, clamped below physical capacity."""
    try:
        cap = pltpu.get_tpu_info().vmem_capacity_bytes
    except Exception:
        cap = 64 * _MIB                      # v7x has the smallest per-TC VMEM
    limit = min(max(int(est_bytes) + 8 * _MIB, 32 * _MIB), cap - 2 * _MIB)
    return pltpu.CompilerParams(dimension_semantics=dim_sem,
                                vmem_limit_bytes=int(limit))


# --------------------------------------------------------------------------
# Kernel 1: fused QKV projection — X streamed from HBM exactly once,
#           stacked weights / biases fully VMEM-resident.
# --------------------------------------------------------------------------
def _qkv_proj_kernel(x_ref, w_ref, b_ref, o_ref, acc_ref):
    # x: (tm, tk)   w: (3, tk, HD)   b: (3, 1, HD)
    # o: (3, tm, HD)                 acc: (3, tm, HD) f32
    k = pl.program_id(1)

    @pl.when(k == 0)
    def _():
        acc_ref[...] = jnp.zeros_like(acc_ref)

    x = x_ref[...]
    for c in range(3):                       # Q, K, V reuse the same X tile
        acc_ref[c] += jnp.dot(x, w_ref[c], preferred_element_type=jnp.float32)

    @pl.when(k == pl.num_programs(1) - 1)
    def _():
        o_ref[...] = (acc_ref[...] + b_ref[...]).astype(o_ref.dtype)


def fused_qkv_projection(x2, w_qkv, b_qkv, *, out_dtype, tm=256, tk=512):
    """x2: (M, hidden), w_qkv: (3, hidden, H*D), b_qkv: (3, 1, H*D)
    -> (3, M, H*D); every X tile is read from HBM exactly once."""
    M, K = x2.shape
    _, _, N = w_qkv.shape
    tm = _pick_tile(M, tm, 8)
    tk = _pick_tile(K, tk, 128)
    grid = (M // tm, K // tk)

    est = (2 * (_nbytes((tm, tk), x2.dtype) + _nbytes((3, tk, N), w_qkv.dtype)
                + _nbytes((3, 1, N), b_qkv.dtype)
                + _nbytes((3, tm, N), out_dtype))
           + _nbytes((3, tm, N), jnp.float32))       # accumulator scratch

    return pl.pallas_call(
        _qkv_proj_kernel,
        out_shape=jax.ShapeDtypeStruct((3, M, N), out_dtype),
        grid=grid,
        in_specs=[
            pl.BlockSpec((tm, tk), lambda i, k: (i, k)),       # X tile (read once)
            pl.BlockSpec((3, tk, N), lambda i, k: (0, k, 0)),  # Wq|Wk|Wv (resident)
            pl.BlockSpec((3, 1, N), lambda i, k: (0, 0, 0)),   # biases  (resident)
        ],
        out_specs=pl.BlockSpec((3, tm, N), lambda i, k: (0, i, 0)),
        scratch_shapes=[pltpu.VMEM((3, tm, N), jnp.float32)],
        compiler_params=_compiler_params(("parallel", "arbitrary"), est),
    )(x2, w_qkv, b_qkv)


# --------------------------------------------------------------------------
# Kernel 2: attention with VMEM-resident K/V (no KV grid axis) + fused W_o.
# --------------------------------------------------------------------------
def _attn_wo_kernel(q_ref, k_ref, v_ref, bias_ref, wo_ref, bo_ref, o_ref,
                    *, num_head, head_dim):
    # q: (1,1,tq,HD)  k/v: (1,1,S,HD)  bias: (1,1,S) f32
    # wo: (HD,hidden) bo: (1,hidden)   o: (1,tq,hidden)
    tq = q_ref.shape[2]
    skv = k_ref.shape[2]
    hidden = wo_ref.shape[1]

    q = q_ref[0, 0]                          # (tq, HD)
    k = k_ref[0, 0]                          # (S,  HD)
    v = v_ref[0, 0]                          # (S,  HD)

    # additive mask bias, broadcast ONCE per grid step (reused by every head)
    bias = jnp.broadcast_to(bias_ref[0], (tq, skv))

    acc = jnp.zeros((tq, hidden), jnp.float32)
    # TODO(synk): for large num_head switch to lax.fori_loop to bound live
    #             ranges; LRA uses num_head <= 8 so a static unroll is fine.
    for h in range(num_head):
        sl = slice(h * head_dim, (h + 1) * head_dim)
        qh = q[:, sl]                        # (tq, D); 1/sqrt(D) folded in W_q
        kh = k[:, sl]                        # (S,  D)
        vh = v[:, sl]                        # (S,  D)

        # scores: contract on D directly (no in-kernel transpose of K)
        s = lax.dot_general(qh, kh, (((1,), (1,)), ((), ())),
                            preferred_element_type=jnp.float32)   # (tq, S)
        s = s + bias

        # full-row softmax (K/V fully resident -> no online rescaling)
        m = jnp.max(s, axis=-1, keepdims=True)
        e = jnp.exp(s - m)
        l = jnp.sum(e, axis=-1, keepdims=True)
        ctx = jnp.dot(e.astype(v.dtype), vh,
                      preferred_element_type=jnp.float32)          # (tq, D)
        ctx = ctx / l                                              # exact norm

        # fold this head's slice of W_o immediately: out += ctx_h @ W_o[h]
        # (sublane-aligned W_o row slice; accumulator stays lane-dense)
        wo_h = wo_ref[pl.ds(h * head_dim, head_dim), :]            # (D, hidden)
        acc = acc + jnp.dot(ctx.astype(wo_ref.dtype), wo_h,
                            preferred_element_type=jnp.float32)

    o_ref[0] = (acc + bo_ref[...]).astype(o_ref.dtype)             # lane-dense


def attention_kernel_call(qkv, bias, wo, bo, *, num_head, head_dim,
                          out_dtype=jnp.float32, tq=256):
    """qkv: (3, B, S, H*D), bias: (B, 1, S) f32, wo: (H*D, hidden),
    bo: (1, hidden) f32 -> (B, S, hidden)."""
    _, B, S, HD = qkv.shape
    hidden = wo.shape[1]
    tq = _pick_tile(S, tq, 8)
    grid = (B, S // tq)
    cd = qkv.dtype

    est = (2 * (_nbytes((tq, HD), cd) + 2 * _nbytes((S, HD), cd)
                + _nbytes((S,), jnp.float32) + _nbytes((HD, hidden), cd)
                + _nbytes((hidden,), jnp.float32)
                + _nbytes((tq, hidden), out_dtype))
           + 3 * tq * S * 4)                 # (tq, S) score/exp working set

    kernel = functools.partial(_attn_wo_kernel,
                               num_head=num_head, head_dim=head_dim)
    return pl.pallas_call(
        kernel,
        out_shape=jax.ShapeDtypeStruct((B, S, hidden), out_dtype),
        grid=grid,
        in_specs=[
            pl.BlockSpec((1, 1, tq, HD), lambda b, qi: (0, b, qi, 0)),  # Q tile
            pl.BlockSpec((1, 1, S, HD), lambda b, qi: (1, b, 0, 0)),    # K (resident)
            pl.BlockSpec((1, 1, S, HD), lambda b, qi: (2, b, 0, 0)),    # V (resident)
            pl.BlockSpec((1, 1, S), lambda b, qi: (b, 0, 0)),           # mask bias
            pl.BlockSpec((HD, hidden), lambda b, qi: (0, 0)),           # W_o
            pl.BlockSpec((1, hidden), lambda b, qi: (0, 0)),            # b_o
        ],
        out_specs=pl.BlockSpec((1, tq, hidden), lambda b, qi: (b, qi, 0)),
        compiler_params=_compiler_params(("parallel", "parallel"), est),
    )(qkv, qkv, qkv, bias, wo, bo)


# --------------------------------------------------------------------------
# Parameter packing (one-time) + full Attention module forward
# --------------------------------------------------------------------------
def prepare_attention_params(params, num_head, head_dim,
                             compute_dtype=jnp.float32):
    """Pack / pre-scale weights ONCE (not per forward call): stack Q/K/V
    projections on a leading axis and fold 1/sqrt(head_dim) into W_q/b_q."""
    scale = 1.0 / math.sqrt(head_dim)
    w_qkv = jnp.stack([params["Wq"] * scale, params["Wk"], params["Wv"]],
                      axis=0).astype(compute_dtype)              # (3, hidden, H*D)
    b_qkv = jnp.stack([params["bq"] * scale, params["bk"], params["bv"]],
                      axis=0)[:, None, :].astype(jnp.float32)    # (3, 1, H*D)
    wo = params["Wo"].astype(compute_dtype)                      # (H*D, hidden)
    bo = params["bo"].astype(jnp.float32).reshape(1, -1)         # (1, hidden)
    return {"w_qkv": w_qkv, "b_qkv": b_qkv, "wo": wo, "bo": bo}


def attention_forward(packed, X, mask, num_head, head_dim, *,
                      compute_dtype=jnp.float32, tm=256, tk=512, tq=256):
    B, S, hidden = X.shape
    HD = num_head * head_dim

    x2 = X.reshape(B * S, hidden).astype(compute_dtype)
    qkv = fused_qkv_projection(x2, packed["w_qkv"], packed["b_qkv"],
                               out_dtype=compute_dtype, tm=tm, tk=tk)
    qkv = qkv.reshape(3, B, S, HD)                               # free reshape

    # Additive mask bias, computed once per batch (not per head / per tile).
    bias = ((mask.astype(jnp.float32) - 1.0) * 1000000.0).reshape(B, 1, S)

    return attention_kernel_call(qkv, bias, packed["wo"], packed["bo"],
                                 num_head=num_head, head_dim=head_dim,
                                 out_dtype=jnp.float32, tq=tq)   # (B, S, hidden)


# Pure-JAX reference (mirrors the PyTorch module exactly) for correctness.
def attention_reference(params, X, mask, num_head, head_dim):
    B, S, hidden = X.shape
    x2 = X.reshape(B * S, hidden)
    Q = (x2 @ params["Wq"] + params["bq"]).reshape(B, S, num_head, head_dim).transpose(0, 2, 1, 3)
    K = (x2 @ params["Wk"] + params["bk"]).reshape(B, S, num_head, head_dim).transpose(0, 2, 1, 3)
    V = (x2 @ params["Wv"] + params["bv"]).reshape(B, S, num_head, head_dim).transpose(0, 2, 1, 3)
    dot = jnp.einsum("bhqd,bhkd->bhqk", Q, K) / math.sqrt(head_dim)
    dot = dot - 1000000.0 * (1.0 - mask[:, None, None, :])
    attn = jax.nn.softmax(dot, axis=-1)
    ctx = jnp.einsum("bhqk,bhkd->bhqd", attn, V)
    ctx = ctx.transpose(0, 2, 1, 3).reshape(B * S, num_head * head_dim)
    out = ctx @ params["Wo"] + params["bo"]
    return out.reshape(B, S, hidden)


def _make_params(key, hidden, num_head, head_dim):
    proj = num_head * head_dim
    ks = jax.random.split(key, 8)
    return {
        "Wq": jax.random.normal(ks[0], (hidden, proj), jnp.float32) * 0.05,
        "bq": jax.random.normal(ks[1], (proj,), jnp.float32) * 0.05,
        "Wk": jax.random.normal(ks[2], (hidden, proj), jnp.float32) * 0.05,
        "bk": jax.random.normal(ks[3], (proj,), jnp.float32) * 0.05,
        "Wv": jax.random.normal(ks[4], (hidden, proj), jnp.float32) * 0.05,
        "bv": jax.random.normal(ks[5], (proj,), jnp.float32) * 0.05,
        "Wo": jax.random.normal(ks[6], (proj, hidden), jnp.float32) * 0.05,
        "bo": jax.random.normal(ks[7], (hidden,), jnp.float32) * 0.05,
    }


if __name__ == "__main__":
    key = jax.random.PRNGKey(0)

    # --- test 1: small config (hidden=32, num_head=2, head_dim=16), f32 -----
    B, S, hidden, num_head, head_dim = 2, 8, 32, 2, 16
    kp, kx = jax.random.split(jax.random.fold_in(key, 1))
    params = _make_params(kp, hidden, num_head, head_dim)
    X = jax.random.normal(kx, (B, S, hidden), jnp.float32)
    mask = jnp.ones((B, S), jnp.float32).at[1, -3:].set(0.0)

    packed = prepare_attention_params(params, num_head, head_dim)
    out = jax.block_until_ready(
        attention_forward(packed, X, mask, num_head, head_dim))
    ref = attention_reference(params, X, mask, num_head, head_dim)
    assert out.shape == (B, S, hidden)
    np.testing.assert_allclose(np.asarray(out), np.asarray(ref),
                               rtol=5e-3, atol=5e-3)

    # --- test 2: tiled path (2 q-tiles per batch row, resident K/V, multi-
    #             head unroll) with bf16 MXU inputs and f32 softmax / accum ---
    B, S, hidden, num_head, head_dim = 2, 256, 128, 4, 32
    kp, kx = jax.random.split(jax.random.fold_in(key, 2))
    params = _make_params(kp, hidden, num_head, head_dim)
    X = jax.random.normal(kx, (B, S, hidden), jnp.float32)
    mask = jnp.ones((B, S), jnp.float32).at[1, -64:].set(0.0)

    packed = prepare_attention_params(params, num_head, head_dim,
                                      compute_dtype=jnp.bfloat16)
    out = jax.block_until_ready(
        attention_forward(packed, X, mask, num_head, head_dim,
                          compute_dtype=jnp.bfloat16, tm=256, tq=128))
    ref = attention_reference(params, X, mask, num_head, head_dim)
    assert out.shape == (B, S, hidden)
    np.testing.assert_allclose(np.asarray(out), np.asarray(ref),
                               rtol=3e-2, atol=3e-2)

    print("KERNEL_OK")
</pallas_src>

<mosaic_0001>
module attributes {stable_mosaic.version = 11 : i64} {
  func.func @_qkv_proj_kernel(%arg0: i32, %arg1: i32, %arg2: memref<16x32xf32, #tpu.memory_space<vmem>>, %arg3: memref<3x32x32xf32, #tpu.memory_space<vmem>>, %arg4: memref<3x1x32xf32, #tpu.memory_space<vmem>>, %arg5: memref<3x16x32xf32, #tpu.memory_space<vmem>>, %arg6: memref<3x16x32xf32, #tpu.memory_space<vmem>>) attributes {dimension_semantics = [#tpu.dimension_semantics<parallel>, #tpu.dimension_semantics<arbitrary>], iteration_bounds = array<i64: 1, 1>, scalar_prefetch = 0 : i64, scratch_operands = 1 : i64, tpu.core_type = #tpu.core_type<tc>, window_params = [{transform_indices = @transform_0, window_bounds = array<i64: 16, 32>}, {transform_indices = @transform_1, window_bounds = array<i64: 3, 32, 32>}, {pipeline_mode = #tpu.pipeline_mode<synchronous>, transform_indices = @transform_2, window_bounds = array<i64: 3, 1, 32>}, {transform_indices = @transform_3, window_bounds = array<i64: 3, 16, 32>}]} {
    %c0_i32 = arith.constant 0 : i32
    %0 = arith.cmpi eq, %arg1, %c0_i32 : i32
    %1 = arith.extui %0 : i1 to i32
    %c0_i32_0 = arith.constant 0 : i32
    %2 = arith.cmpi ne, %1, %c0_i32_0 : i32
    scf.if %2 {
      %cst_31 = arith.constant 0.000000e+00 : f32
      %34 = vector.broadcast %cst_31 : f32 to vector<3x16x32xf32>
      %c0_32 = arith.constant 0 : index
      %c0_33 = arith.constant 0 : index
      %c0_34 = arith.constant 0 : index
      %35 = vector.load %arg6[%c0_32, %c0_33, %c0_34] : memref<3x16x32xf32, #tpu.memory_space<vmem>>, vector<3x16x32xf32>
      tpu.vector_store %arg6[%c0_32, %c0_33, %c0_34], %34 {strides = array<i32>} : memref<3x16x32xf32, #tpu.memory_space<vmem>>, vector<3x16x32xf32>,
    } else {
    }
    %c0 = arith.constant 0 : index
    %c0_1 = arith.constant 0 : index
    %3 = vector.load %arg2[%c0, %c0_1] : memref<16x32xf32, #tpu.memory_space<vmem>>, vector<16x32xf32>
    %c0_2 = arith.constant 0 : index
    %c0_3 = arith.constant 0 : index
    %c0_4 = arith.constant 0 : index
    %4 = vector.load %arg6[%c0_2, %c0_3, %c0_4] : memref<3x16x32xf32, #tpu.memory_space<vmem>>, vector<1x16x32xf32>
    %5 = vector.shape_cast %4 : vector<1x16x32xf32> to vector<16x32xf32>
    %c0_5 = arith.constant 0 : index
    %c0_6 = arith.constant 0 : index
    %c0_7 = arith.constant 0 : index
    %6 = vector.load %arg3[%c0_5, %c0_6, %c0_7] : memref<3x32x32xf32, #tpu.memory_space<vmem>>, vector<1x32x32xf32>
    %7 = vector.shape_cast %6 : vector<1x32x32xf32> to vector<32x32xf32>
    %cst = arith.constant dense<0.000000e+00> : vector<16x32xf32>
    %8 = tpu.matmul %3, %7, %cst {dimension_numbers = #tpu.dot_dimension_numbers<[1], [0], [0], [1], [0, 0, 1, 1], [], []>} : vector<16x32xf32>, vector<32x32xf32>, vector<16x32xf32> -> vector<16x32xf32>
    %9 = arith.addf %5, %8 : vector<16x32xf32>
    %c0_8 = arith.constant 0 : index
    %c0_9 = arith.constant 0 : index
    %c0_10 = arith.constant 0 : index
    %10 = vector.load %arg6[%c0_8, %c0_9, %c0_10] : memref<3x16x32xf32, #tpu.memory_space<vmem>>, vector<1x16x32xf32>
    %11 = vector.shape_cast %10 : vector<1x16x32xf32> to vector<16x32xf32>
    %12 = vector.shape_cast %9 : vector<16x32xf32> to vector<1x16x32xf32>
    tpu.vector_store %arg6[%c0_8, %c0_9, %c0_10], %12 {strides = array<i32>} : memref<3x16x32xf32, #tpu.memory_space<vmem>>, vector<1x16x32xf32>,
    %c1 = arith.constant 1 : index
    %c0_11 = arith.constant 0 : index
    %c0_12 = arith.constant 0 : index
    %13 = vector.load %arg6[%c1, %c0_11, %c0_12] : memref<3x16x32xf32, #tpu.memory_space<vmem>>, vector<1x16x32xf32>
    %14 = vector.shape_cast %13 : vector<1x16x32xf32> to vector<16x32xf32>
    %c1_13 = arith.constant 1 : index
    %c0_14 = arith.constant 0 : index
    %c0_15 = arith.constant 0 : index
    %15 = vector.load %arg3[%c1_13, %c0_14, %c0_15] : memref<3x32x32xf32, #tpu.memory_space<vmem>>, vector<1x32x32xf32>
    %16 = vector.shape_cast %15 : vector<1x32x32xf32> to vector<32x32xf32>
    %cst_16 = arith.constant dense<0.000000e+00> : vector<16x32xf32>
    %17 = tpu.matmul %3, %16, %cst_16 {dimension_numbers = #tpu.dot_dimension_numbers<[1], [0], [0], [1], [0, 0, 1, 1], [], []>} : vector<16x32xf32>, vector<32x32xf32>, vector<16x32xf32> -> vector<16x32xf32>
    %18 = arith.addf %14, %17 : vector<16x32xf32>
    %c1_17 = arith.constant 1 : index
    %c0_18 = arith.constant 0 : index
    %c0_19 = arith.constant 0 : index
    %19 = vector.load %arg6[%c1_17, %c0_18, %c0_19] : memref<3x16x32xf32, #tpu.memory_space<vmem>>, vector<1x16x32xf32>
    %20 = vector.shape_cast %19 : vector<1x16x32xf32> to vector<16x32xf32>
    %21 = vector.shape_cast %18 : vector<16x32xf32> to vector<1x16x32xf32>
    tpu.vector_store %arg6[%c1_17, %c0_18, %c0_19], %21 {strides = array<i32>} : memref<3x16x32xf32, #tpu.memory_space<vmem>>, vector<1x16x32xf32>,
    %c2 = arith.constant 2 : index
    %c0_20 = arith.constant 0 : index
    %c0_21 = arith.constant 0 : index
    %22 = vector.load %arg6[%c2, %c0_20, %c0_21] : memref<3x16x32xf32, #tpu.memory_space<vmem>>, vector<1x16x32xf32>
    %23 = vector.shape_cast %22 : vector<1x16x32xf32> to vector<16x32xf32>
    %c2_22 = arith.constant 2 : index
    %c0_23 = arith.constant 0 : index
    %c0_24 = arith.constant 0 : index
    %24 = vector.load %arg3[%c2_22, %c0_23, %c0_24] : memref<3x32x32xf32, #tpu.memory_space<vmem>>, vector<1x32x32xf32>
    %25 = vector.shape_cast %24 : vector<1x32x32xf32> to vector<32x32xf32>
    %cst_25 = arith.constant dense<0.000000e+00> : vector<16x32xf32>
    %26 = tpu.matmul %3, %25, %cst_25 {dimension_numbers = #tpu.dot_dimension_numbers<[1], [0], [0], [1], [0, 0, 1, 1], [], []>} : vector<16x32xf32>, vector<32x32xf32>, vector<16x32xf32> -> vector<16x32xf32>
    %27 = arith.addf %23, %26 : vector<16x32xf32>
    %c2_26 = arith.constant 2 : index
    %c0_27 = arith.constant 0 : index
    %c0_28 = arith.constant 0 : index
    %28 = vector.load %arg6[%c2_26, %c0_27, %c0_28] : memref<3x16x32xf32, #tpu.memory_space<vmem>>, vector<1x16x32xf32>
    %29 = vector.shape_cast %28 : vector<1x16x32xf32> to vector<16x32xf32>
    %30 = vector.shape_cast %27 : vector<16x32xf32> to vector<1x16x32xf32>
    tpu.vector_store %arg6[%c2_26, %c0_27, %c0_28], %30 {strides = array<i32>} : memref<3x16x32xf32, #tpu.memory_space<vmem>>, vector<1x16x32xf32>,
    %c0_i32_29 = arith.constant 0 : i32
    %31 = arith.cmpi eq, %arg1, %c0_i32_29 : i32
    %32 = arith.extui %31 : i1 to i32
    %c0_i32_30 = arith.constant 0 : i32
    %33 = arith.cmpi ne, %32, %c0_i32_30 : i32
    scf.if %33 {
      %c0_31 = arith.constant 0 : index
      %c0_32 = arith.constant 0 : index
      %c0_33 = arith.constant 0 : index
      %34 = vector.load %arg6[%c0_31, %c0_32, %c0_33] : memref<3x16x32xf32, #tpu.memory_space<vmem>>, vector<3x16x32xf32>
      %c0_34 = arith.constant 0 : index
      %c0_35 = arith.constant 0 : index
      %c0_36 = arith.constant 0 : index
      %35 = vector.load %arg4[%c0_34, %c0_35, %c0_36] : memref<3x1x32xf32, #tpu.memory_space<vmem>>, vector<3x1x32xf32>
      %36 = vector.broadcast %35 : vector<3x1x32xf32> to vector<3x16x32xf32>
      %37 = arith.addf %34, %36 : vector<3x16x32xf32>
      %c0_37 = arith.constant 0 : index
      %c0_38 = arith.constant 0 : index
      %c0_39 = arith.constant 0 : index
      %38 = vector.load %arg5[%c0_37, %c0_38, %c0_39] : memref<3x16x32xf32, #tpu.memory_space<vmem>>, vector<3x16x32xf32>
      tpu.vector_store %arg5[%c0_37, %c0_38, %c0_39], %37 {strides = array<i32>} : memref<3x16x32xf32, #tpu.memory_space<vmem>>, vector<3x16x32xf32>,
    } else {
    }
    return
  }
  func.func @transform_0(%arg0: i32, %arg1: i32) -> (i32, i32) {
    %c0_i32 = arith.constant 0 : i32
    return %arg0, %arg1 : i32, i32
  }
  func.func @transform_1(%arg0: i32, %arg1: i32) -> (i32, i32, i32) {
    %c0_i32 = arith.constant 0 : i32
    %c0_i32_0 = arith.constant 0 : i32
    %c0_i32_1 = arith.constant 0 : i32
    return %c0_i32, %arg1, %c0_i32_0 : i32, i32, i32
  }
  func.func @transform_2(%arg0: i32, %arg1: i32) -> (i32, i32, i32) {
    %c0_i32 = arith.constant 0 : i32
    %c0_i32_0 = arith.constant 0 : i32
    %c0_i32_1 = arith.constant 0 : i32
    %c0_i32_2 = arith.constant 0 : i32
    return %c0_i32, %c0_i32_0, %c0_i32_1 : i32, i32, i32
  }
  func.func @transform_3(%arg0: i32, %arg1: i32) -> (i32, i32, i32) {
    %c0_i32 = arith.constant 0 : i32
    %c0_i32_0 = arith.constant 0 : i32
    %c0_i32_1 = arith.constant 0 : i32
    return %c0_i32, %arg0, %c0_i32_0 : i32, i32, i32
  }
}

</mosaic_0001>

<bundles_post_ra>
// kernel: tpu_custom_call.1
= control target key start
LH: loop header
LB: loop body
LE: loop exit
PB: predicated region body
PF: predicated region fallthrough
CT: control target
= control target key end

     0   :  { %8 = vsyncpa [#allocation4], 0  ;;  %s648_s0 = inlined_call_operand.hbm [shape: f32[16,32], index: 0, kind: input, shape index: {}]   ;;  %s649_s1 = inlined_call_operand.hbm [shape: f32[3,32,32], index: 1, kind: input, shape index: {}]   ;;  %s650_s2 = inlined_call_operand.vmem [shape: f32[3,1,32], index: 2, kind: input, shape index: {}]   ;;  %s651_s3 = inlined_call_operand.hbm [shape: f32[3,16,32], index: 3, kind: output, shape index: {}]  }
   0x1   :  { %9 = vsyncpa [#allocation7], 0 }
   0x2   :  { %10 = vsyncpa [#allocation5], 0  ;;  %s544_s12 = smov [#allocation3]   ;;  %s472_s16 = scalar_lea.hbm %s648_s0, 256 }
   0x3   :  { %s16_s13 = sshll.u32 %s544_s12, 4  ;;  %p473_p0 = scmp.ne.s32.totalorder %s648_s0, %s472_s16  ;;  %s17_s13 = int_to_ptr.vmem [resolvable:$true] %s16_s13 }
   0x4   :  { %p476_p1 = scmp.lt.u32.totalorder %s472_s16, %s648_s0 }
   0x6   :  { %p478_p2 = pnand %p476_p1, %p473_p0 }
   0x8   :  { %481 = shalt.err (!%p478_p2)
}
   0x9   :  { %s482_s21 = scalar_lea.vmem %s17_s13, 256  ;;  %p487_p4 = scmp.lt.s32.totalorder %s17_s13, %s17_s13 }
   0xa   :  { %p483_p3 = scmp.ne.s32.totalorder %s17_s13, %s482_s21  ;;  %p488_p5 = scmp.lt.s32.totalorder %s482_s21, %s482_s21 }
   0xc   :  { %p489_p6 = por %p488_p5, %p487_p4 }
   0xe   :  { %p490_p7 = pnand %p489_p6, %p483_p3 }
  0x10   :  { %493 = shalt.err (!%p490_p7)
}
  0x11   :  { %s545_s22 = smov 128   ;;  %s546_s23 = smov 8  }
  0x12   :  { %22 = dma.hbm_to_vmem [thread:$0]  %s648_s0, 256, %s17_s13, [#allocation4], %s545_s22, %s545_s22, %s546_s23  }
  0x13   :  { %s547_s26 = smov [#allocation6]   ;;  %s494_s30 = scalar_lea.hbm %s649_s1, 1536 }
  0x14   :  { %s28_s27 = sshll.u32 %s547_s26, 4  ;;  %p495_p8 = scmp.ne.s32.totalorder %s649_s1, %s494_s30  ;;  %s29_s27 = int_to_ptr.vmem [resolvable:$true] %s28_s27 }
  0x15   :  { %p498_p9 = scmp.lt.u32.totalorder %s494_s30, %s649_s1 }
  0x17   :  { %p500_p10 = pnand %p498_p9, %p495_p8 }
  0x19   :  { %503 = shalt.err (!%p500_p10)
}
  0x1a   :  { %s504_s8 = scalar_lea.vmem %s29_s27, 1536  ;;  %p509_p12 = scmp.lt.s32.totalorder %s29_s27, %s29_s27 }
  0x1b   :  { %p505_p11 = scmp.ne.s32.totalorder %s29_s27, %s504_s8  ;;  %p510_p13 = scmp.lt.s32.totalorder %s504_s8, %s504_s8 }
  0x1d   :  { %p511_p0 = por %p510_p13, %p509_p12 }
  0x1f   :  { %p512_p1 = pnand %p511_p0, %p505_p11 }
  0x21   :  { %515 = shalt.err (!%p512_p1)
}
  0x22   :  { %34 = dma.hbm_to_vmem [thread:$0]  %s649_s1, 1536, %s29_s27, [#allocation7], %s545_s22, %s545_s22, %s546_s23  }
  0x23   :  { %538 = dma.done.wait [#allocation4], 256  }
  0x24   :  { %539 = vsyncadd [#allocation4], 4294967040 }
  0x25   :  { %540 = dma.done.wait [#allocation7], 1536  }
  0x26   :  { %541 = vsyncadd [#allocation7], 4294965760  ;;  %vm47_vm0 = vcmask 261120   ;;  %v548_v0 = vmov 0.0   ;;  %v58_v1 = vld [vmem:[#allocation6] sm:$0xff]  ;;  %v59_v2 = vld [vmem:[#allocation6 + $0x8] sm:$0xff] }
  0x27   :  { %49 = vst.msk [vmem:[#allocation2 + $0x8] sm:$0xff] %vm47_vm0, %v548_v0  ;;  %48 = vst.msk [vmem:[#allocation2] sm:$0xff] %vm47_vm0, %v548_v0  ;;  %v60_v3 = vld [vmem:[#allocation6 + $0x10] sm:$0xff]  ;;  %v442_v4 = vpack.c.bf16 %v59_v2, %v58_v1  ;;  %v61_v5 = vld [vmem:[#allocation6 + $0x18] sm:$0xff]  ;;  %s549_s15 = smov [#allocation8]  }
  0x28   :  { %50 = vst.msk [vmem:[#allocation2 + $0x10] sm:$0xff] %vm47_vm0, %v548_v0  ;;  %51 = vst.msk [vmem:[#allocation2 + $0x18] sm:$0xff] %vm47_vm0, %v548_v0  ;;  %v54_v6 = vld [vmem:[#allocation3] sm:$0xff]  ;;  %v152_v7 = vld [vmem:[#allocation6 + $0x20] sm:$0xff]  ;;  %v446_v8 = vpack.c.bf16 %v61_v5, %v60_v3  ;;  %s369_s16 = sshll.u32 %s549_s15, 4  ;;  %s370_s16 = int_to_ptr.vmem [resolvable:$true] %s369_s16 }
  0x29   :  { %52 = vst.msk [vmem:[#allocation2 + $0x20] sm:$0xff] %vm47_vm0, %v548_v0  ;;  %53 = vst.msk [vmem:[#allocation2 + $0x28] sm:$0xff] %vm47_vm0, %v548_v0  ;;  %417 = vmatprep.mubr.msk.f32.mxu0 %vm47_vm0, %v54_v6  ;;  %v153_v9 = vld [vmem:[#allocation6 + $0x28] sm:$0xff]  ;;  %v239_v10 = vld [vmem:[#allocation6 + $0x40] sm:$0xff]  ;;  %428 = vmatprep.mubr.msk.f32.mxu1 %vm47_vm0, %v54_v6  ;;  %s516_s17 = scalar_lea.vmem %s370_s16, 768  ;;  %p521_p3 = scmp.lt.s32.totalorder %s370_s16, %s370_s16 }
  0x2a   :  { %443 = vmatprep.subr.bf16.mxu0 %v442_v4  ;;  %v450_v11 = vpack.c.bf16 %v153_v9, %v152_v7  ;;  %v240_v12 = vld [vmem:[#allocation6 + $0x48] sm:$0xff]  ;;  %v154_v13 = vld [vmem:[#allocation6 + $0x30] sm:$0xff]  ;;  %v155_v14 = vld [vmem:[#allocation6 + $0x38] sm:$0xff]  ;;  %p517_p2 = scmp.ne.s32.totalorder %s370_s16, %s516_s17  ;;  %p522_p4 = scmp.lt.s32.totalorder %s516_s17, %s516_s17 }
  0x2b   :  { %445 = vmatpush3.bf16.msra.mxu0 %v442_v4  ;;  %v454_v15 = vpack.c.bf16 %v155_v14, %v154_v13  ;;  %v458_v16 = vpack.c.bf16 %v240_v12, %v239_v10  ;;  %v241_v17 = vld [vmem:[#allocation6 + $0x50] sm:$0xff]  ;;  %v242_v18 = vld [vmem:[#allocation6 + $0x58] sm:$0xff]  ;;  %v388_v36 = vld [vmem:[%s650_s2] ss:$0 sm:$0xff] }
  0x2c   :  { %447 = vmatprep.subr.bf16.mxu0 %v446_v8  ;;  %451 = vmatprep.subr.bf16.mxu1 %v450_v11  ;;  %v55_v19 = vld [vmem:[#allocation3 + $0x8] sm:$0xff]  ;;  %v462_v20 = vpack.c.bf16 %v242_v18, %v241_v17  ;;  %v389_v41 = vld [vmem:[%s650_s2 + $0x1] ss:$0 sm:$0xff]  ;;  %v390_v49 = vld [vmem:[%s650_s2 + $0x2] ss:$0 sm:$0xff]  ;;  %p523_p5 = por %p522_p4, %p521_p3 }
  0x2d   :  { %453 = vmatpush3.bf16.msra.mxu1 %v450_v11 }
  0x2e   :  { %455 = vmatprep.subr.bf16.mxu1 %v454_v15  ;;  %v57_v21 = vld [vmem:[#allocation2 + $0x8] sm:$0xff]  ;;  %v56_v22 = vld [vmem:[#allocation2] sm:$0xff]  ;;  %p524_p6 = pnand %p523_p5, %p517_p2 }
  0x2f   :  { %449 = vmatpush3.bf16.msra.mxu0 %v446_v8  ;;  %v150_v24 = vld [vmem:[#allocation2 + $0x18] sm:$0xff]  ;;  %v149_v27 = vld [vmem:[#allocation2 + $0x10] sm:$0xff] }
  0x30   :  { %459 = vmatprep.subr.bf16.mxu0 %v458_v16  ;;  %v237_v33 = vld [vmem:[#allocation2 + $0x28] sm:$0xff]  ;;  %v236_v34 = vld [vmem:[#allocation2 + $0x20] sm:$0xff] }
  0x31   :  { %457 = vmatpush3.bf16.msra.mxu1 %v454_v15 }
  0x32   :  { %418 = vmatmul.mubr.msk.f32.vlgmr.msra.gmra.mrb[0].mxu0 %vm47_vm0, %v55_v19 }
  0x33   :  { %461 = vmatpush3.bf16.msra.mxu0 %v458_v16  ;;  %439 = vmatprep.mubr.msk.f32.mxu0 %vm47_vm0, %v54_v6 }
  0x34   :  { %463 = vmatprep.subr.bf16.mxu0 %v462_v20  ;;  %429 = vmatmul.mubr.msk.f32.vlgmr.msra.gmra.mrb[0].mxu1 %vm47_vm0, %v55_v19 }
  0x37   :  { %465 = vmatpush3.bf16.msra.mxu0 %v462_v20 }
  0x3a   :  { %440 = vmatmul.mubr.msk.f32.vlgmr.msra.gmra.mrb[2].mxu0 %vm47_vm0, %v55_v19 }
 0x105   :  { %v419_v23 = vpop.f32.mrb[0].mxu0 }
 0x106   :  { %v145_v25 = vadd.f32 %v419_v23, %v57_v21  ;;  %v135_v26 = vpop.f32.mrb[1].mxu0 }
 0x107   :  { %v144_v28 = vadd.f32 %v135_v26, %v56_v22  ;;  %v430_v29 = vpop.f32.mrb[0].mxu1 }
 0x108   :  { %147 = vst.msk [vmem:[#allocation2 + $0x8] sm:$0xff] %vm47_vm0, %v145_v25  ;;  %v232_v30 = vadd.f32 %v430_v29, %v150_v24  ;;  %v222_v31 = vpop.f32.mrb[1].mxu1 }
 0x109   :  { %146 = vst.msk [vmem:[#allocation2] sm:$0xff] %vm47_vm0, %v144_v28  ;;  %v231_v32 = vadd.f32 %v222_v31, %v149_v27 }
 0x10a   :  { %234 = vst.msk [vmem:[#allocation2 + $0x18] sm:$0xff] %vm47_vm0, %v232_v30 }
 0x10b   :  { %233 = vst.msk [vmem:[#allocation2 + $0x10] sm:$0xff] %vm47_vm0, %v231_v32 }
 0x10d   :  { %v441_v35 = vpop.f32.mrb[2].mxu0 }
 0x10e   :  { %v319_v37 = vadd.f32 %v441_v35, %v237_v33  ;;  %v309_v38 = vpop.f32.mrb[3].mxu0 }
 0x10f   :  { %v318_v39 = vadd.f32 %v309_v38, %v236_v34  ;;  %v326_v40 = vld [vmem:[#allocation2 + $0x8] sm:$0xff] }
 0x110   :  { %321 = vst.msk [vmem:[#allocation2 + $0x28] sm:$0xff] %vm47_vm0, %v319_v37  ;;  %v325_v42 = vld [vmem:[#allocation2] sm:$0xff]  ;;  %v353_v43 = vadd.f32 %v388_v36, %v326_v40 }
 0x111   :  { %320 = vst.msk [vmem:[#allocation2 + $0x20] sm:$0xff] %vm47_vm0, %v318_v39  ;;  %v328_v44 = vld [vmem:[#allocation2 + $0x18] sm:$0xff]  ;;  %v352_v45 = vadd.f32 %v388_v36, %v325_v42 }
 0x112   :  { %v327_v46 = vld [vmem:[#allocation2 + $0x10] sm:$0xff]  ;;  %v355_v47 = vadd.f32 %v389_v41, %v328_v44  ;;  %359 = vst.msk [vmem:[#allocation8 + $0x8] sm:$0xff] %vm47_vm0, %v353_v43 }
 0x113   :  { %v354_v48 = vadd.f32 %v389_v41, %v327_v46  ;;  %358 = vst.msk [vmem:[#allocation8] sm:$0xff] %vm47_vm0, %v352_v45 }
 0x114   :  { %361 = vst.msk [vmem:[#allocation8 + $0x18] sm:$0xff] %vm47_vm0, %v355_v47 }
 0x115   :  { %360 = vst.msk [vmem:[#allocation8 + $0x10] sm:$0xff] %vm47_vm0, %v354_v48 }
 0x117   :  { %v330_v50 = vld [vmem:[#allocation2 + $0x28] sm:$0xff] }
 0x118   :  { %v329_v51 = vld [vmem:[#allocation2 + $0x20] sm:$0xff]  ;;  %v357_v52 = vadd.f32 %v390_v49, %v330_v50 }
 0x119   :  { %v356_v53 = vadd.f32 %v390_v49, %v329_v51 }
 0x11a   :  { %363 = vst.msk [vmem:[#allocation8 + $0x28] sm:$0xff] %vm47_vm0, %v357_v52 }
 0x11b   :  { %362 = vst.msk [vmem:[#allocation8 + $0x20] sm:$0xff] %vm47_vm0, %v356_v53 }
 0x11c   :  { %527 = shalt.err (!%p524_p6)
}
 0x11d   :  { %s528_s19 = scalar_lea.hbm %s651_s3, 768 }
 0x11e   :  { %p529_p7 = scmp.ne.s32.totalorder %s651_s3, %s528_s19  ;;  %p532_p8 = scmp.lt.u32.totalorder %s528_s19, %s651_s3 }
 0x120   :  { %p534_p9 = pnand %p532_p8, %p529_p7 }
 0x122   :  { %537 = shalt.err (!%p534_p9)
}
 0x123   :  { %375 = dma.vmem_to_hbm [thread:$0]  %s370_s16, 768, %s651_s3, [#allocation5], %s545_s22, %s545_s22, %s546_s23  }
 0x124   :  { %542 = dma.done.wait [#allocation5], 768  }
 0x125   :  { %543 = vsyncadd [#allocation5], 4294966528 }
 0x126   :  { %379 = vsyncpa [#allocation4], 1 }
 0x127   :  { %380 = vsyncpa [#allocation7], 1 }
 0x128   :  { %381 = vsyncpa [#allocation5], 1 }

</bundles_post_ra>
